<compile_context>
chip_gen: v6e
topology: v6e:2x2x1
jax: 0.10.0
libtpu: 0.0.40
codegen_flags: <defaults>
</compile_context>

<pallas_src>
import jax
import jax.numpy as jnp
from jax.experimental import pallas as pl
from jax.experimental.pallas import tpu as pltpu


def _round_up(x, m):
    return ((x + m - 1) // m) * m


_VMEM_LIMIT_BYTES = 32 * 1024 * 1024          # safe on v5e/v6e/v7x
_RESIDENT_WEIGHT_BYTES = 8 * 1024 * 1024      # keep whole weight in VMEM below this


# ----------------------------------------------------------------------------
# Kernels
# ----------------------------------------------------------------------------
def _linear_resident_kernel(x_ref, w_ref, b_ref, o_ref):
    """Whole (padded) weight + bias resident in VMEM; grid iterates batch only.

    x_ref: [tm, Fp] bf16, w_ref: [Fp, Cp] bf16, b_ref: [1, Cp] f32,
    o_ref: [tm, Cp] f32.
    """
    acc = jnp.dot(x_ref[...], w_ref[...], preferred_element_type=jnp.float32)
    o_ref[...] = (acc + b_ref[...]).astype(o_ref.dtype)


def _linear_tiled_kernel(x_ref, w_ref, b_ref, o_ref):
    """3-D grid (batch, class, K); the f32 output block IS the accumulator.

    The output block index is independent of k (the last grid axis), so o_ref
    stays resident across the K reduction. Bias is folded into the k==0 init.
    """
    k = pl.program_id(2)

    @pl.when(k == 0)
    def _():
        o_ref[...] = pl.broadcast_to(b_ref[...], o_ref.shape).astype(o_ref.dtype)

    o_ref[...] += jnp.dot(x_ref[...], w_ref[...],
                          preferred_element_type=jnp.float32)


# ----------------------------------------------------------------------------
# Wrapper
# ----------------------------------------------------------------------------
def _tile_nk(F, C):
    tk = 1024 if F >= 1024 else _round_up(F, 128)
    tn = 512 if C >= 512 else _round_up(C, 128)
    return tn, tk


def _tile_m(B):
    # bf16 operands -> sublane (second-to-last) dim must be a multiple of 16.
    return 512 if B >= 512 else _round_up(B, 16)


def prepare_linear_params(weight, bias, operand_dtype=jnp.bfloat16):
    """One-time prep (hoisted out of the per-call hot path).

    weight: [C, F], bias: [C]  ->  padded, transposed bf16 weight [Fp, Cp]
    plus padded f32 bias [1, Cp] and tiling metadata.
    """
    C, F = weight.shape
    tn, tk = _tile_nk(F, C)
    Fp = _round_up(F, tk)
    Cp = _round_up(C, tn)

    # Pre-transpose once -> [F, C]: C lands on the lane axis (MXU RHS layout),
    # and the kernel body never transposes.
    w_p = jnp.pad(weight.T, ((0, Fp - F), (0, Cp - C))).astype(operand_dtype)
    b_p = jnp.pad(bias, (0, Cp - C)).astype(jnp.float32).reshape(1, Cp)

    return {
        "w": w_p, "b": b_p,
        "F": F, "C": C, "Fp": Fp, "Cp": Cp,
        "tn": tn, "tk": tk,
    }


def logistic_regression_forward(x, params):
    """out = x @ weight.T + bias  (PyTorch nn.Linear semantics).

    x: [B, F] float32; params from prepare_linear_params -> [B, C] float32.
    """
    B, F = x.shape
    assert F == params["F"], "feature dim mismatch"

    w_p, b_p = params["w"], params["b"]
    Fp, Cp = params["Fp"], params["Cp"]
    tn, tk = params["tn"], params["tk"]
    C = params["C"]

    operand_dtype = w_p.dtype
    itemsize = jnp.dtype(operand_dtype).itemsize

    tm = _tile_m(B)
    Bp = _round_up(B, tm)

    # Skip the pad entirely when x is already tile-aligned and the right dtype.
    if (B, F) == (Bp, Fp) and x.dtype == operand_dtype:
        x_p = x
    else:
        x_p = jnp.pad(x, ((0, Bp - B), (0, Fp - F))).astype(operand_dtype)

    weight_bytes = Fp * Cp * itemsize

    if weight_bytes <= _RESIDENT_WEIGHT_BYTES:
        # ------------------------------------------------------------------
        # Resident-weight path: weight + bias fetched from HBM exactly once,
        # grid over the batch axis only, no accumulator scratch.
        # ------------------------------------------------------------------
        grid = (Bp // tm,)
        cost = pl.CostEstimate(
            flops=2 * Bp * Fp * Cp,
            transcendentals=0,
            bytes_accessed=(Bp * Fp * itemsize      # x, streamed once
                            + Fp * Cp * itemsize    # weight, fetched once
                            + Cp * 4                # bias (f32)
                            + Bp * Cp * 4),         # output (f32)
        )
        out_p = pl.pallas_call(
            _linear_resident_kernel,
            out_shape=jax.ShapeDtypeStruct((Bp, Cp), jnp.float32),
            grid_spec=pltpu.PrefetchScalarGridSpec(
                num_scalar_prefetch=0,
                grid=grid,
                in_specs=[
                    pl.BlockSpec((tm, Fp), lambda i: (i, 0)),
                    pl.BlockSpec((Fp, Cp), lambda i: (0, 0)),   # resident
                    pl.BlockSpec((1, Cp), lambda i: (0, 0)),    # resident
                ],
                out_specs=pl.BlockSpec((tm, Cp), lambda i: (i, 0)),
            ),
            compiler_params=pltpu.CompilerParams(
                dimension_semantics=("parallel",),
                vmem_limit_bytes=_VMEM_LIMIT_BYTES,
            ),
            cost_estimate=cost,
        )(x_p, w_p, b_p)
    else:
        # ------------------------------------------------------------------
        # Tiled path for large layers: 3-D grid, K-reduction last, f32 output
        # block doubles as the accumulator, bias folded into the k==0 init.
        # ------------------------------------------------------------------
        grid = (Bp // tm, Cp // tn, Fp // tk)
        cost = pl.CostEstimate(
            flops=2 * Bp * Fp * Cp,
            transcendentals=0,
            bytes_accessed=((Cp // tn) * Bp * Fp * itemsize   # x re-streamed per class tile
                            + (Bp // tm) * Fp * Cp * itemsize  # weight re-streamed per batch tile
                            + Cp * 4
                            + Bp * Cp * 4),
        )
        out_p = pl.pallas_call(
            _linear_tiled_kernel,
            out_shape=jax.ShapeDtypeStruct((Bp, Cp), jnp.float32),
            grid_spec=pltpu.PrefetchScalarGridSpec(
                num_scalar_prefetch=0,
                grid=grid,
                in_specs=[
                    pl.BlockSpec((tm, tk), lambda i, j, k: (i, k)),
                    pl.BlockSpec((tk, tn), lambda i, j, k: (k, j)),
                    pl.BlockSpec((1, tn), lambda i, j, k: (0, j)),
                ],
                out_specs=pl.BlockSpec((tm, tn), lambda i, j, k: (i, j)),
            ),
            compiler_params=pltpu.CompilerParams(
                dimension_semantics=("parallel", "parallel", "arbitrary"),
                vmem_limit_bytes=_VMEM_LIMIT_BYTES,
            ),
            cost_estimate=cost,
        )(x_p, w_p, b_p)

    # Slice the lane/sublane padding back off.
    return out_p[:B, :C]


if __name__ == "__main__":
    # Small shapes consistent with the module: input_size=32, num_classes=8.
    batch, input_size, num_classes = 4, 32, 8

    key = jax.random.PRNGKey(0)
    kx, kw, kb = jax.random.split(key, 3)

    # Deterministic init mimicking PyTorch Linear's U(-1/sqrt(F), 1/sqrt(F)).
    bound = 1.0 / (input_size ** 0.5)
    weight = jax.random.uniform(
        kw, (num_classes, input_size), jnp.float32, minval=-bound, maxval=bound
    )
    bias = jax.random.uniform(
        kb, (num_classes,), jnp.float32, minval=-bound, maxval=bound
    )
    x = jax.random.normal(kx, (batch, input_size), jnp.float32)

    # Weight prep hoisted out of the per-call hot path (done once per model).
    params = prepare_linear_params(weight, bias)

    out = logistic_regression_forward(x, params)
    out = jax.block_until_ready(out)

    # Correctness check against plain JAX f32 reference. Tolerance relaxed
    # because the MXU operands are bf16 (accumulation is f32).
    ref = x @ weight.T + bias
    assert out.shape == (batch, num_classes)
    assert jnp.allclose(out, ref, atol=5e-2, rtol=5e-2), float(
        jnp.max(jnp.abs(out - ref))
    )

    print("KERNEL_OK")
</pallas_src>

<mosaic_0001>
module attributes {stable_mosaic.version = 11 : i64} {
  func.func @_linear_resident_kernel(%arg0: i32, %arg1: memref<16x128xbf16, #tpu.memory_space<vmem>>, %arg2: memref<128x128xbf16, #tpu.memory_space<vmem>>, %arg3: memref<1x128xf32, #tpu.memory_space<vmem>>, %arg4: memref<16x128xf32, #tpu.memory_space<vmem>>) attributes {dimension_semantics = [#tpu.dimension_semantics<parallel>], iteration_bounds = array<i64: 1>, scalar_prefetch = 0 : i64, scratch_operands = 0 : i64, tpu.core_type = #tpu.core_type<tc>, window_params = [{transform_indices = @transform_0, window_bounds = array<i64: 16, 128>}, {pipeline_mode = #tpu.pipeline_mode<synchronous>, transform_indices = @transform_1, window_bounds = array<i64: 128, 128>}, {pipeline_mode = #tpu.pipeline_mode<synchronous>, transform_indices = @transform_2, window_bounds = array<i64: 1, 128>}, {transform_indices = @transform_3, window_bounds = array<i64: 16, 128>}]} {
    %c0 = arith.constant 0 : index
    %c0_0 = arith.constant 0 : index
    %0 = vector.load %arg1[%c0, %c0_0] : memref<16x128xbf16, #tpu.memory_space<vmem>>, vector<16x128xbf16>
    %c0_1 = arith.constant 0 : index
    %c0_2 = arith.constant 0 : index
    %1 = vector.load %arg2[%c0_1, %c0_2] : memref<128x128xbf16, #tpu.memory_space<vmem>>, vector<128x128xbf16>
    %cst = arith.constant dense<0.000000e+00> : vector<16x128xf32>
    %2 = tpu.matmul %0, %1, %cst {dimension_numbers = #tpu.dot_dimension_numbers<[1], [0], [0], [1], [0, 0, 1, 1], [], []>} : vector<16x128xbf16>, vector<128x128xbf16>, vector<16x128xf32> -> vector<16x128xf32>
    %c0_3 = arith.constant 0 : index
    %c0_4 = arith.constant 0 : index
    %3 = vector.load %arg3[%c0_3, %c0_4] : memref<1x128xf32, #tpu.memory_space<vmem>>, vector<1x128xf32>
    %4 = vector.broadcast %3 : vector<1x128xf32> to vector<16x128xf32>
    %5 = arith.addf %2, %4 : vector<16x128xf32>
    %c0_5 = arith.constant 0 : index
    %c0_6 = arith.constant 0 : index
    %6 = vector.load %arg4[%c0_5, %c0_6] : memref<16x128xf32, #tpu.memory_space<vmem>>, vector<16x128xf32>
    tpu.vector_store %arg4[%c0_5, %c0_6], %5 {strides = array<i32>} : memref<16x128xf32, #tpu.memory_space<vmem>>, vector<16x128xf32>,
    return
  }
  func.func @transform_0(%arg0: i32) -> (i32, i32) {
    %c0_i32 = arith.constant 0 : i32
    %c0_i32_0 = arith.constant 0 : i32
    return %arg0, %c0_i32 : i32, i32
  }
  func.func @transform_1(%arg0: i32) -> (i32, i32) {
    %c0_i32 = arith.constant 0 : i32
    %c0_i32_0 = arith.constant 0 : i32
    %c0_i32_1 = arith.constant 0 : i32
    return %c0_i32, %c0_i32_0 : i32, i32
  }
  func.func @transform_2(%arg0: i32) -> (i32, i32) {
    %c0_i32 = arith.constant 0 : i32
    %c0_i32_0 = arith.constant 0 : i32
    %c0_i32_1 = arith.constant 0 : i32
    return %c0_i32, %c0_i32_0 : i32, i32
  }
  func.func @transform_3(%arg0: i32) -> (i32, i32) {
    %c0_i32 = arith.constant 0 : i32
    %c0_i32_0 = arith.constant 0 : i32
    return %arg0, %c0_i32 : i32, i32
  }
}

</mosaic_0001>

<bundles_post_ra>
// kernel: tpu_custom_call.1
= control target key start
LH: loop header
LB: loop body
LE: loop exit
PB: predicated region body
PF: predicated region fallthrough
CT: control target
= control target key end

     0   :  { %8 = vsyncpa [#allocation3], 0  ;;  %s348_s0 = inlined_call_operand.hbm [shape: bf16[16,128], index: 0, kind: input, shape index: {}]   ;;  %s349_s1 = inlined_call_operand.hbm [shape: bf16[128,128], index: 1, kind: input, shape index: {}]   ;;  %s350_s2 = inlined_call_operand.vmem [shape: f32[1,128], index: 2, kind: input, shape index: {}]   ;;  %s351_s3 = inlined_call_operand.hbm [shape: f32[16,128], index: 3, kind: output, shape index: {}]  }
   0x1   :  { %9 = vsyncpa [#allocation6], 0 }
   0x2   :  { %10 = vsyncpa [#allocation4], 0  ;;  %s307_s12 = smov [#allocation2]  }
   0x3   :  { %s16_s13 = sshll.u32 %s307_s12, 4  ;;  %s17_s13 = int_to_ptr.vmem [resolvable:$true] %s16_s13 }
   0x4   :  { %s249_s14 = scalar_lea.vmem %s17_s13, 128  ;;  %p254_p1 = scmp.lt.s32.totalorder %s17_s13, %s17_s13 }
   0x5   :  { %p250_p0 = scmp.ne.s32.totalorder %s17_s13, %s249_s14  ;;  %p255_p2 = scmp.lt.s32.totalorder %s249_s14, %s249_s14 }
   0x7   :  { %p256_p3 = por %p255_p2, %p254_p1 }
   0x9   :  { %p257_p4 = pnand %p256_p3, %p250_p0 }
   0xb   :  { %260 = shalt.err (!%p257_p4)
}
   0xc   :  { %s308_s15 = smov 64   ;;  %s309_s16 = smov 4  }
   0xd   :  { %22 = dma.hbm_to_vmem [thread:$0]  %s348_s0, 128, %s17_s13, [#allocation3], %s308_s15, %s308_s15, %s309_s16  }
   0xe   :  { %s310_s19 = smov [#allocation5]  }
   0xf   :  { %s28_s20 = sshll.u32 %s310_s19, 4  ;;  %s29_s20 = int_to_ptr.vmem [resolvable:$true] %s28_s20 }
  0x10   :  { %s269_s21 = scalar_lea.vmem %s29_s20, 1024  ;;  %p274_p6 = scmp.lt.s32.totalorder %s29_s20, %s29_s20 }
  0x11   :  { %p270_p5 = scmp.ne.s32.totalorder %s29_s20, %s269_s21  ;;  %p275_p7 = scmp.lt.s32.totalorder %s269_s21, %s269_s21 }
  0x13   :  { %p276_p8 = por %p275_p7, %p274_p6 }
  0x15   :  { %p277_p9 = pnand %p276_p8, %p270_p5 }
  0x17   :  { %280 = shalt.err (!%p277_p9)
}
  0x18   :  { %34 = dma.hbm_to_vmem [thread:$0]  %s349_s1, 1024, %s29_s20, [#allocation6], %s308_s15, %s308_s15, %s309_s16  }
  0x19   :  { %301 = dma.done.wait [#allocation3], 128  }
  0x1a   :  { %302 = vsyncadd [#allocation3], 4294967168 }
  0x1b   :  { %303 = dma.done.wait [#allocation6], 1024  }
  0x1c   :  { %304 = vsyncadd [#allocation6], 4294966272  ;;  %v311_v0 = vmov 0.0   ;;  %vm312_vm0 = vmmov 0   ;;  %v232_v1 = vld [vmem:[#allocation5 + $0x38] sm:$0xff]   ;;  %v233_v2 = vld [vmem:[#allocation5 + $0x30] sm:$0xff]  }
  0x1d   :  { %203 = vmatprep.subr.bf16.mxu0 %v311_v0  ;;  %219 = vmatprep.mubr.msk.bf16.mxu0 %vm312_vm0, %v311_v0  ;;  %v234_v3 = vld [vmem:[#allocation5 + $0x28] sm:$0xff]   ;;  %v235_v4 = vld [vmem:[#allocation5 + $0x20] sm:$0xff]   ;;  %v236_v5 = vld [vmem:[#allocation5 + $0x18] sm:$0xff]   ;;  %s313_s24 = smov [#allocation7]  }
  0x1e   :  { %204 = vmatpush3.bf16.msra.mxu0 %v232_v1  ;;  %v237_v6 = vld [vmem:[#allocation5 + $0x10] sm:$0xff]   ;;  %v238_v7 = vld [vmem:[#allocation5 + $0x8] sm:$0xff]   ;;  %v239_v8 = vld [vmem:[#allocation5] sm:$0xff]   ;;  %s171_s25 = sshll.u32 %s313_s24, 4  ;;  %s172_s25 = int_to_ptr.vmem [resolvable:$true] %s171_s25 }
  0x1f   :  { %205 = vmatprep.subr.bf16.mxu0 %v311_v0  ;;  %v240_v9 = vld [vmem:[#allocation2] sm:$0xff]   ;;  %s281_s26 = scalar_lea.vmem %s172_s25, 256  ;;  %p286_p11 = scmp.lt.s32.totalorder %s172_s25, %s172_s25 }
  0x20   :  { %v184_v10 = vld [vmem:[%s350_s2] ss:$0 sm:$0xff]  ;;  %p282_p10 = scmp.ne.s32.totalorder %s172_s25, %s281_s26  ;;  %p287_p12 = scmp.lt.s32.totalorder %s281_s26, %s281_s26 }
  0x22   :  { %206 = vmatpush3.bf16.msra.mxu0 %v233_v2  ;;  %p288_p13 = por %p287_p12, %p286_p11 }
  0x23   :  { %207 = vmatprep.subr.bf16.mxu0 %v311_v0 }
  0x24   :  { %p289_p0 = pnand %p288_p13, %p282_p10 }
  0x26   :  { %208 = vmatpush3.bf16.msra.mxu0 %v234_v3 }
  0x27   :  { %209 = vmatprep.subr.bf16.mxu0 %v311_v0 }
  0x2a   :  { %210 = vmatpush3.bf16.msra.mxu0 %v235_v4 }
  0x2b   :  { %211 = vmatprep.subr.bf16.mxu0 %v311_v0 }
  0x2e   :  { %212 = vmatpush3.bf16.msra.mxu0 %v236_v5 }
  0x2f   :  { %213 = vmatprep.subr.bf16.mxu0 %v311_v0 }
  0x32   :  { %214 = vmatpush3.bf16.msra.mxu0 %v237_v6 }
  0x33   :  { %215 = vmatprep.subr.bf16.mxu0 %v311_v0 }
  0x36   :  { %216 = vmatpush3.bf16.msra.mxu0 %v238_v7 }
  0x37   :  { %217 = vmatprep.subr.bf16.mxu0 %v311_v0 }
  0x3a   :  { %218 = vmatpush3.bf16.msra.mxu0 %v239_v8 }
  0x3d   :  { %220 = vmatmul.mubr.bf16.vlgmr.msra.gmra.mxu0 %v240_v9 }
  0xfd   :  { %v157_v11 = vpop.f32.mrf.mxu0 }
  0xfe   :  { %v158_v12 = vadd.f32 %v184_v10, %v157_v11 }
  0xff   :  { %v221_v13 = vpop.f32.mrf.mxu0 }
 0x100   :  { %164 = vst [vmem:[#allocation7] sm:$0xff] %v158_v12 }
 0x101   :  { %v160_v14 = vpop.f32.mrf.mxu0 }
 0x102   :  { %v161_v15 = vadd.f32 %v184_v10, %v160_v14 }
 0x103   :  { %v222_v16 = vpop.f32.mrf.mxu0 }
 0x104   :  { %165 = vst [vmem:[#allocation7 + $0x8] sm:$0xff] %v161_v15 }
 0x105   :  { %292 = shalt.err (!%p289_p0)
}
 0x106   :  { %s314_s27 = smov 128   ;;  %s315_s2 = smov 8  }
 0x107   :  { %177 = dma.vmem_to_hbm [thread:$0]  %s172_s25, 256, %s351_s3, [#allocation4], %s314_s27, %s314_s27, %s315_s2  }
 0x108   :  { %305 = dma.done.wait [#allocation4], 256  }
 0x109   :  { %306 = vsyncadd [#allocation4], 4294967040 }
 0x10a   :  { %181 = vsyncpa [#allocation3], 1 }
 0x10b   :  { %182 = vsyncpa [#allocation6], 1 }
 0x10c   :  { %183 = vsyncpa [#allocation4], 1 }

</bundles_post_ra>
